<compile_context>
chip_gen: v7x
topology: tpu7x:2x2x1
jax: 0.10.0
libtpu: 0.0.40
codegen_flags: <defaults>
</compile_context>

<pallas_src>
import functools

import jax
import jax.numpy as jnp
from jax.experimental import pallas as pl
from jax.experimental.pallas import tpu as pltpu


# ---------------------------------------------------------------------------
# Kernels
# ---------------------------------------------------------------------------

def _copy_kernel(z_ref, o_ref):
    # Lane-dense 2-D copy; identical input/output layout, straight vld/vst.
    o_ref[...] = z_ref[...]


def _norm_second_moment_kernel(z_ref, o_ref, *, eps):
    # normalize_second_moment(x, dim=1): x * rsqrt(mean(x^2, axis=-1) + eps).
    # Reduction is per-row over the lane axis, so partial edge blocks on the
    # batch axis stay correct (out-of-bounds rows are masked on store).
    x = z_ref[...].astype(jnp.float32)
    ms = jnp.mean(x * x, axis=-1, keepdims=True)
    o_ref[...] = (x * jax.lax.rsqrt(ms + eps)).astype(o_ref.dtype)


# ---------------------------------------------------------------------------
# Block sizing (per review: large batch tiles, sized for the smallest VMEM
# budget across generations — ~2 MiB/block => ~8 MiB double-buffered, safely
# under v5e's 16 MiB default scoped limit and v7x's 64 MiB physical VMEM).
# ---------------------------------------------------------------------------

def _pick_block_rows(B, Z, itemsize, target_bytes=2 << 20):
    if B <= 8 or B % 8 != 0:
        # Tiny or ragged batch: one whole-array block (block == full dims is
        # always legal regardless of the (8, 128) constraint).
        return B
    tb = (target_bytes // (Z * itemsize)) // 8 * 8
    tb = int(max(8, min(tb, B)))
    return tb


def _row_tiled_call(kernel, z, *, flops, transcendentals):
    B, Z = z.shape
    itemsize = jnp.dtype(z.dtype).itemsize
    tb = _pick_block_rows(B, Z, itemsize)
    grid = (pl.cdiv(B, tb),)
    return pl.pallas_call(
        kernel,
        out_shape=jax.ShapeDtypeStruct((B, Z), z.dtype),
        grid=grid,
        in_specs=[pl.BlockSpec((tb, Z), lambda i: (i, 0))],
        out_specs=pl.BlockSpec((tb, Z), lambda i: (i, 0)),
        compiler_params=pltpu.CompilerParams(
            dimension_semantics=("parallel",)),
        cost_estimate=pl.CostEstimate(
            flops=flops,
            transcendentals=transcendentals,
            bytes_accessed=2 * B * Z * itemsize),
    )(z)


# ---------------------------------------------------------------------------
# Module-equivalent wrappers
# ---------------------------------------------------------------------------

def dummy_mapping(z, c=None, **kwargs):
    """Pallas equivalent of DummyMapping.forward: returns z.unsqueeze(1).

    `c` and kwargs are accepted and ignored, mirroring the PyTorch module.
    NOTE: the cheapest correct implementation is simply `z[:, None, :]` (a free
    metadata reshape).  The Pallas kernel is kept per task requirement, but it
    only performs a layout-identical 2-D copy; the unsqueeze happens outside.
    """
    B, Z = z.shape
    out2d = _row_tiled_call(_copy_kernel, z, flops=0, transcendentals=0)
    return out2d[:, None, :]  # free metadata reshape == torch.unsqueeze(1)


def mapping_then_normalize(z, c=None, eps=1e-8, **kwargs):
    """Fused DummyMapping + normalize_second_moment(w[:, 0]).

    Generator.forward computes w = mapping(z, c) = z.unsqueeze(1) and synthesis
    immediately does normalize_second_moment(w[:, 0]) == normalize_second_moment(z).
    This kernel folds that first real op into the mapping's HBM round trip and
    returns the normalized (B, Z) latent that would feed InitLayer.
    """
    B, Z = z.shape
    kern = functools.partial(_norm_second_moment_kernel, eps=eps)
    # ~3 flops/element (square, multiply, add for the mean) + one rsqrt per row.
    return _row_tiled_call(kern, z, flops=3 * B * Z, transcendentals=B)


# ---------------------------------------------------------------------------
# Demo / self-check
# ---------------------------------------------------------------------------

if __name__ == "__main__":
    key = jax.random.PRNGKey(0)
    kz, kc = jax.random.split(key)

    B, Z, C = 2, 256, 16  # Generator default z_dim=256; c is ignored by mapping
    z = jax.random.normal(kz, (B, Z), dtype=jnp.float32)
    c = jax.random.normal(kc, (B, C), dtype=jnp.float32)

    # --- DummyMapping: w = z.unsqueeze(1) ------------------------------------
    w = dummy_mapping(z, c)
    jax.block_until_ready(w)
    assert w.shape == (B, 1, Z), w.shape
    assert w.dtype == z.dtype
    assert jnp.array_equal(w, z[:, None, :])

    # --- fused mapping + normalize_second_moment (entry op of synthesis) -----
    x = mapping_then_normalize(z, c)
    jax.block_until_ready(x)
    ref = z * jax.lax.rsqrt(jnp.mean(z * z, axis=1, keepdims=True) + 1e-8)
    assert x.shape == (B, Z)
    assert jnp.allclose(x, ref, rtol=1e-6, atol=1e-6)

    print("KERNEL_OK")
</pallas_src>

<mosaic_0001>
module attributes {stable_mosaic.version = 11 : i64} {
  func.func @_copy_kernel(%arg0: i32, %arg1: memref<2x256xf32, #tpu.memory_space<vmem>>, %arg2: memref<2x256xf32, #tpu.memory_space<vmem>>) attributes {dimension_semantics = [#tpu.dimension_semantics<parallel>], iteration_bounds = array<i64: 1>, scalar_prefetch = 0 : i64, scratch_operands = 0 : i64, tpu.core_type = #tpu.core_type<tc>, window_params = [{transform_indices = @transform_0, window_bounds = array<i64: 2, 256>}, {transform_indices = @transform_1, window_bounds = array<i64: 2, 256>}]} {
    %c0 = arith.constant 0 : index
    %c0_0 = arith.constant 0 : index
    %0 = vector.load %arg1[%c0, %c0_0] : memref<2x256xf32, #tpu.memory_space<vmem>>, vector<2x256xf32>
    %c0_1 = arith.constant 0 : index
    %c0_2 = arith.constant 0 : index
    %1 = vector.load %arg2[%c0_1, %c0_2] : memref<2x256xf32, #tpu.memory_space<vmem>>, vector<2x256xf32>
    tpu.vector_store %arg2[%c0_1, %c0_2], %0 {strides = array<i32>} : memref<2x256xf32, #tpu.memory_space<vmem>>, vector<2x256xf32>,
    return
  }
  func.func @transform_0(%arg0: i32) -> (i32, i32) {
    %c0_i32 = arith.constant 0 : i32
    %c0_i32_0 = arith.constant 0 : i32
    return %arg0, %c0_i32 : i32, i32
  }
  func.func @transform_1(%arg0: i32) -> (i32, i32) {
    %c0_i32 = arith.constant 0 : i32
    %c0_i32_0 = arith.constant 0 : i32
    return %arg0, %c0_i32 : i32, i32
  }
}

</mosaic_0001>

<bundles_post_ra>
// kernel: tpu_custom_call.1
= control target key start
LH: loop header
LB: loop body
LE: loop exit
PB: predicated region body
PF: predicated region fallthrough
CT: control target
= control target key end

     0   :  { %6 = vsyncpa [#allocation3], 0  ;;  %s124_s0 = inlined_call_operand.hbm [shape: f32[2,256], index: 0, kind: input, shape index: {}]   ;;  %s125_s1 = inlined_call_operand.hbm [shape: f32[2,256], index: 1, kind: output, shape index: {}]  }
   0x1   :  { %7 = vsyncpa [#allocation4], 0  ;;  %s88_s6 = smov [#allocation2]   ;;  %s40_s10 = scalar_lea.hbm %s124_s0, 64 }
   0x2   :  { %s14_s7 = sshll.u32 %s88_s6, 4  ;;  %p41_p0 = scmp.ne.s32.totalorder %s124_s0, %s40_s10  ;;  %s15_s7 = int_to_ptr.vmem [resolvable:$true] %s14_s7 }
   0x3   :  { %p44_p1 = scmp.lt.u32.totalorder %s40_s10, %s124_s0 }
   0x5   :  { %p46_p2 = pnand %p44_p1, %p41_p0 }
   0x7   :  { %49 = shalt.err (!%p46_p2)
}
   0x8   :  { %s50_s15 = scalar_lea.vmem %s15_s7, 64  ;;  %p55_p4 = scmp.lt.s32.totalorder %s15_s7, %s15_s7 }
   0x9   :  { %p51_p3 = scmp.ne.s32.totalorder %s15_s7, %s50_s15  ;;  %p56_p5 = scmp.lt.s32.totalorder %s50_s15, %s50_s15 }
   0xb   :  { %p57_p6 = por %p56_p5, %p55_p4 }
   0xd   :  { %p58_p7 = pnand %p57_p6, %p51_p3 }
   0xf   :  { %61 = shalt.err (!%p58_p7)
}
  0x10   :  { %17 = dma.hbm_to_vmem [thread:$0]  %s124_s0, 64, %s15_s7, [#allocation3]  }
  0x11   :  { %84 = dma.done.wait [#allocation3], 64  }
  0x12   :  { %85 = vsyncadd [#allocation3], 4294967232  ;;  %s89_s18 = smov [#allocation5]   ;;  %v21_v0 = vld [vmem:[#allocation2] sm:$0xf] }
  0x13   :  { %s29_s19 = sshll.u32 %s89_s18, 4  ;;  %22 = vst [vmem:[#allocation5] sm:$0xf] %v21_v0  ;;  %s30_s19 = int_to_ptr.vmem [resolvable:$true] %s29_s19 }
  0x14   :  { %s62_s20 = scalar_lea.vmem %s30_s19, 64  ;;  %p67_p9 = scmp.lt.s32.totalorder %s30_s19, %s30_s19 }
  0x15   :  { %p63_p8 = scmp.ne.s32.totalorder %s30_s19, %s62_s20  ;;  %p68_p10 = scmp.lt.s32.totalorder %s62_s20, %s62_s20 }
  0x17   :  { %p69_p11 = por %p68_p10, %p67_p9 }
  0x19   :  { %p70_p12 = pnand %p69_p11, %p63_p8 }
  0x1b   :  { %73 = shalt.err (!%p70_p12)
}
  0x1c   :  { %s74_s23 = scalar_lea.hbm %s125_s1, 64 }
  0x1d   :  { %p75_p13 = scmp.ne.s32.totalorder %s125_s1, %s74_s23  ;;  %p78_p0 = scmp.lt.u32.totalorder %s74_s23, %s125_s1 }
  0x1f   :  { %p80_p1 = pnand %p78_p0, %p75_p13 }
  0x21   :  { %83 = shalt.err (!%p80_p1)
}
  0x22   :  { %32 = dma.vmem_to_hbm [thread:$0]  %s30_s19, 64, %s125_s1, [#allocation4]  }
  0x23   :  { %86 = dma.done.wait [#allocation4], 64  }
  0x24   :  { %87 = vsyncadd [#allocation4], 4294967232 }
  0x25   :  { %36 = vsyncpa [#allocation3], 1 }
  0x26   :  { %37 = vsyncpa [#allocation4], 1 }

</bundles_post_ra>
